<compile_context>
chip_gen: v7x
topology: tpu7x:2x2x1
jax: 0.10.0
libtpu: 0.0.40
codegen_flags: <defaults>
</compile_context>

<pallas_src>
import functools

import jax
import jax.numpy as jnp
from jax.experimental import pallas as pl
from jax.experimental.pallas import tpu as pltpu


def _vmem_capacity_bytes():
    try:
        info = pltpu.get_tpu_info()
        cap = getattr(info, "vmem_capacity_bytes", None)
        if cap:
            return int(cap)
    except Exception:
        pass
    return 64 * 1024 * 1024  # conservative default (v7x-sized)


# ---------------------------------------------------------------------------
# Kernel A: "packed" layout, logits (1, C, t_s, 128); pixels fill the full vreg.
# ---------------------------------------------------------------------------
def _masked_ce_kernel_packed(res_ref, gt_ref, mask_ref, num_ref, den_ref,
                             num_acc, den_acc, *, num_classes, total_rows,
                             rows_per_tile, tiles_per_core, with_softmax,
                             needs_tail_mask):
    core = pl.program_id(1)
    t = pl.program_id(2)

    @pl.when(t == 0)
    def _():
        num_acc[...] = jnp.zeros_like(num_acc)
        den_acc[...] = jnp.zeros_like(den_acc)

    mask = mask_ref[0].astype(jnp.float32)                       # (t_s, 128)
    if needs_tail_mask:
        g = core * tiles_per_core + t                            # unclamped tile id
        row = jax.lax.broadcasted_iota(jnp.int32, mask.shape, 0) + g * rows_per_tile
        valid = row < total_rows
        mask = jnp.where(valid, mask, 0.0)

    gt = gt_ref[0]                                               # (t_s, 128) int

    # Per-class unrolled loop: full-vreg VPU ops on (t_s, 128) slabs.
    slabs = [res_ref[0, c].astype(jnp.float32) for c in range(num_classes)]
    sel = jnp.zeros_like(slabs[0])
    for c in range(num_classes):
        sel = jnp.where(gt == c, slabs[c], sel)

    if with_softmax:
        m = slabs[0]
        for c in range(1, num_classes):
            m = jnp.maximum(m, slabs[c])
        z = jnp.zeros_like(m)
        for c in range(num_classes):
            z = z + jnp.exp(slabs[c] - m)
        loss = m + jnp.log(z) - sel                              # logsumexp - logit[gt]
    else:
        loss = -jnp.log(sel)                                     # NLL on probabilities

    # TODO(synk): a masked-out valid pixel with inf loss gives inf*0 = NaN, which
    # matches the PyTorch reference arithmetic; guard here if robustness is needed.
    contrib = loss * mask
    if needs_tail_mask:
        # Garbage logits in out-of-range rows can be inf/NaN; 0*inf = NaN, so the
        # invalid lanes must be zeroed explicitly, not just via the zeroed mask.
        contrib = jnp.where(valid, contrib, 0.0)

    num_acc[...] += contrib
    den_acc[...] += mask

    @pl.when(t == tiles_per_core - 1)
    def _():
        num_ref[0, 0] = jnp.sum(num_acc[...], keepdims=True)
        den_ref[0, 0] = jnp.sum(den_acc[...], keepdims=True)


# ---------------------------------------------------------------------------
# Kernel B: lane-dense fallback, logits (1, C, t_hw); classes on sublanes.
# ---------------------------------------------------------------------------
def _masked_ce_kernel_flat(res_ref, gt_ref, mask_ref, num_ref, den_ref,
                           num_acc, den_acc, *, num_classes, total_px,
                           px_per_tile, tiles_per_core, with_softmax,
                           needs_tail_mask):
    core = pl.program_id(1)
    t = pl.program_id(2)

    @pl.when(t == 0)
    def _():
        num_acc[...] = jnp.zeros_like(num_acc)
        den_acc[...] = jnp.zeros_like(den_acc)

    mask = mask_ref[0].astype(jnp.float32)                       # (1, t_hw)
    if needs_tail_mask:
        g = core * tiles_per_core + t
        col = jax.lax.broadcasted_iota(jnp.int32, mask.shape, 1) + g * px_per_tile
        valid = col < total_px
        mask = jnp.where(valid, mask, 0.0)

    logits = res_ref[0].astype(jnp.float32)                      # (C, t_hw)
    gt = gt_ref[0]                                               # (1, t_hw) int

    # One-hot select via a (C, 1) iota broadcast (no full-tile int32 iota).
    cls = jax.lax.broadcasted_iota(jnp.int32, (num_classes, 1), 0)
    sel = jnp.sum(jnp.where(cls == gt, logits, 0.0), axis=0, keepdims=True)

    if with_softmax:
        m = jnp.max(logits, axis=0, keepdims=True)
        lse = m + jnp.log(jnp.sum(jnp.exp(logits - m), axis=0, keepdims=True))
        loss = lse - sel
    else:
        loss = -jnp.log(sel)

    contrib = loss * mask
    if needs_tail_mask:
        contrib = jnp.where(valid, contrib, 0.0)

    num_acc[...] += contrib
    den_acc[...] += mask

    @pl.when(t == tiles_per_core - 1)
    def _():
        num_ref[0, 0] = jnp.sum(num_acc[...], keepdims=True)
        den_ref[0, 0] = jnp.sum(den_acc[...], keepdims=True)


def masked_cross_entropy_loss(res, gt, mask, *, with_softmax=True,
                              pixels_per_tile=None):
    """res: (N, C, H, W) float; gt: (N, H, W) int; mask: (N, H, W) -> scalar."""
    N, C, H, W = res.shape
    HW = H * W

    if not jnp.issubdtype(res.dtype, jnp.floating):
        res = res.astype(jnp.float32)
    if not jnp.issubdtype(gt.dtype, jnp.integer):
        gt = gt.astype(jnp.int32)            # rare path; mirrors gt.long()
    if mask.dtype == jnp.bool_:
        mask = mask.astype(jnp.float32)
    # gt / mask otherwise keep their (possibly narrow) dtypes: no wrapper astype
    # pass over HBM; the per-tile cast to int32/f32 happens inside the kernel.

    res_isz = jnp.dtype(res.dtype).itemsize
    gt_isz = jnp.dtype(gt.dtype).itemsize
    mask_isz = jnp.dtype(mask.dtype).itemsize

    # ---- generation-aware tile budget (v7x: 64 MiB VMEM, v5e/v6e: 128 MiB) ----
    vmem_cap = _vmem_capacity_bytes()
    if pixels_per_tile is None:
        budget = min(vmem_cap // 2, 48 * 1024 * 1024)
        # double-buffered input blocks + f32 scratch + ~(C+3) f32 temporaries, per px
        per_px = 2 * (C * res_isz + gt_isz + mask_isz) + 4 * (C + 5)
        max_px = max(1024, budget // per_px)
        # keep a single logits block in the ~4-8 MiB range
        max_px = min(max_px, (8 * 1024 * 1024) // max(1, C * res_isz))
        max_px = max(1024, max_px)
    else:
        max_px = max(128, int(pixels_per_tile))

    use_packed = (HW % 128 == 0) and (C <= 8)

    if use_packed:
        S = HW // 128
        t_rows = max_px // 128
        if t_rows >= S:
            t_rows = S                              # full dim (allowed even if not %8)
        else:
            t_rows = max(8, (t_rows // 8) * 8)
        n_t = -(-S // t_rows)
        total, t_size = S, t_rows
    else:
        if HW <= max_px:
            t_px = HW                               # full pixel axis in one block
        else:
            t_px = max(128, (min(max_px, HW) // 128) * 128)
        n_t = -(-HW // t_px)
        total, t_size = HW, t_px

    # 2-way split of the pixel-tile range so v7x megacore is busy even for N == 1;
    # on 1-TC chips this only adds one cheap extra partial per sample.
    n_cores = 2 if n_t >= 2 else 1
    tiles_per_core = -(-n_t // n_cores)
    clamp = (n_cores * tiles_per_core) != n_t       # odd tile count -> phantom tile
    needs_tail_mask = clamp or (n_t * t_size != total)

    def tile_idx(c, t):
        g = c * tiles_per_core + t
        if clamp:
            g = jnp.minimum(g, n_t - 1)             # phantom tile re-reads last block
        return g

    if use_packed:
        # Free reshapes (row-major NCHW / NHW): no extra HBM pass.
        res_k = res.reshape(N, C, S, 128)
        gt_k = gt.reshape(N, S, 128)
        mask_k = mask.reshape(N, S, 128)
        kernel = functools.partial(
            _masked_ce_kernel_packed, num_classes=C, total_rows=S,
            rows_per_tile=t_size, tiles_per_core=tiles_per_core,
            with_softmax=with_softmax, needs_tail_mask=needs_tail_mask)
        in_specs = [
            pl.BlockSpec((1, C, t_size, 128), lambda n, c, t: (n, 0, tile_idx(c, t), 0)),
            pl.BlockSpec((1, t_size, 128), lambda n, c, t: (n, tile_idx(c, t), 0)),
            pl.BlockSpec((1, t_size, 128), lambda n, c, t: (n, tile_idx(c, t), 0)),
        ]
        scratch = [pltpu.VMEM((t_size, 128), jnp.float32),
                   pltpu.VMEM((t_size, 128), jnp.float32)]
    else:
        res_k = res.reshape(N, C, HW)
        gt_k = gt.reshape(N, 1, HW)
        mask_k = mask.reshape(N, 1, HW)
        kernel = functools.partial(
            _masked_ce_kernel_flat, num_classes=C, total_px=HW,
            px_per_tile=t_size, tiles_per_core=tiles_per_core,
            with_softmax=with_softmax, needs_tail_mask=needs_tail_mask)
        in_specs = [
            pl.BlockSpec((1, C, t_size), lambda n, c, t: (n, 0, tile_idx(c, t))),
            pl.BlockSpec((1, 1, t_size), lambda n, c, t: (n, 0, tile_idx(c, t))),
            pl.BlockSpec((1, 1, t_size), lambda n, c, t: (n, 0, tile_idx(c, t))),
        ]
        scratch = [pltpu.VMEM((1, t_size), jnp.float32),
                   pltpu.VMEM((1, t_size), jnp.float32)]

    out_specs = [
        pl.BlockSpec((1, 1, 1, 1), lambda n, c, t: (n, c, 0, 0)),
        pl.BlockSpec((1, 1, 1, 1), lambda n, c, t: (n, c, 0, 0)),
    ]

    num, den = pl.pallas_call(
        kernel,
        out_shape=(jax.ShapeDtypeStruct((N, n_cores, 1, 1), jnp.float32),
                   jax.ShapeDtypeStruct((N, n_cores, 1, 1), jnp.float32)),
        grid_spec=pltpu.PrefetchScalarGridSpec(
            num_scalar_prefetch=0,
            grid=(N, n_cores, tiles_per_core),
            in_specs=in_specs,
            out_specs=out_specs,
            scratch_shapes=scratch,
        ),
        compiler_params=pltpu.CompilerParams(
            dimension_semantics=("parallel", "parallel", "arbitrary"),
            vmem_limit_bytes=int(min(vmem_cap, 128 * 1024 * 1024) * 3 // 4),
        ),
    )(res_k, gt_k, mask_k)

    num = jnp.sum(num[:, :, 0, 0], axis=1)          # (N,)
    den = jnp.sum(den[:, :, 0, 0], axis=1)          # (N,)
    # TODO(synk): samples with an all-zero mask give 0/0 = NaN, matching the
    # PyTorch reference; guard with jnp.where(den > 0, ...) if real data needs it.
    return jnp.mean(num / den)


# ---------------------------------------------------------------------------
# Pure-JAX reference + tests
# ---------------------------------------------------------------------------
def _reference(res, gt, mask, with_softmax=True):
    res = res.astype(jnp.float32)
    logp = jax.nn.log_softmax(res, axis=1) if with_softmax else jnp.log(res)
    gathered = jnp.take_along_axis(
        logp, gt[:, None, :, :].astype(jnp.int32), axis=1)[:, 0]   # (N, H, W)
    loss = -gathered * mask.astype(jnp.float32)
    sample = loss.sum(axis=(1, 2)) / mask.astype(jnp.float32).sum(axis=(1, 2))
    return jnp.mean(sample)


def _run_case(key, N, C, H, W, with_softmax, pixels_per_tile=None, use_probs=False):
    k1, k2, k3 = jax.random.split(key, 3)
    res = jax.random.normal(k1, (N, C, H, W), dtype=jnp.float32)
    if use_probs:
        res = jax.nn.softmax(res, axis=1)
    gt = jax.random.randint(k2, (N, H, W), 0, C, dtype=jnp.int32)
    mask = (jax.random.uniform(k3, (N, H, W)) > 0.3).astype(jnp.float32)
    mask = mask.at[:, 0, 0].set(1.0)   # guarantee nonzero mask per sample
    out = masked_cross_entropy_loss(res, gt, mask, with_softmax=with_softmax,
                                    pixels_per_tile=pixels_per_tile)
    out = jax.block_until_ready(out)
    ref = _reference(res, gt, mask, with_softmax=with_softmax)
    assert jnp.allclose(out, ref, rtol=1e-4, atol=1e-5), (N, C, H, W, out, ref)


if __name__ == "__main__":
    key = jax.random.PRNGKey(0)
    keys = jax.random.split(key, 5)
    # packed layout (HW % 128 == 0, small C), single tile, CrossEntropy path
    _run_case(keys[0], 2, 4, 16, 16, with_softmax=True)
    # NLL-on-probabilities path (with_softmax=False)
    _run_case(keys[1], 2, 4, 16, 16, with_softmax=False, use_probs=True)
    # flat fallback layout: HW=117 (< 128, not lane-aligned), C=5
    _run_case(keys[2], 2, 5, 9, 13, with_softmax=True)
    # packed layout, odd tile count -> 2-way core split + clamp + tail masking
    _run_case(keys[3], 1, 4, 40, 64, with_softmax=True, pixels_per_tile=1024)
    # flat layout, odd tile count -> core split + partial edge block + tail masking
    _run_case(keys[4], 3, 6, 10, 30, with_softmax=True, pixels_per_tile=128)
    print("KERNEL_OK")
</pallas_src>

<mosaic_0001>
module attributes {stable_mosaic.version = 11 : i64} {
  func.func @_masked_ce_kernel_packed(%arg0: i32, %arg1: i32, %arg2: i32, %arg3: memref<1x4x2x128xf32, #tpu.memory_space<vmem>>, %arg4: memref<1x2x128xi32, #tpu.memory_space<vmem>>, %arg5: memref<1x2x128xf32, #tpu.memory_space<vmem>>, %arg6: memref<1x1x1x1xf32, #tpu.memory_space<vmem>>, %arg7: memref<1x1x1x1xf32, #tpu.memory_space<vmem>>, %arg8: memref<2x128xf32, #tpu.memory_space<vmem>>, %arg9: memref<2x128xf32, #tpu.memory_space<vmem>>) attributes {dimension_semantics = [#tpu.dimension_semantics<parallel>, #tpu.dimension_semantics<parallel>, #tpu.dimension_semantics<arbitrary>], iteration_bounds = array<i64: 2, 1, 1>, scalar_prefetch = 0 : i64, scratch_operands = 2 : i64, tpu.core_type = #tpu.core_type<tc>, window_params = [{transform_indices = @transform_0, window_bounds = array<i64: 1, 4, 2, 128>}, {transform_indices = @transform_1, window_bounds = array<i64: 1, 2, 128>}, {transform_indices = @transform_2, window_bounds = array<i64: 1, 2, 128>}, {transform_indices = @transform_3, window_bounds = array<i64: 1, 1, 1, 1>}, {transform_indices = @transform_4, window_bounds = array<i64: 1, 1, 1, 1>}]} {
    %c0_i32 = arith.constant 0 : i32
    %0 = arith.cmpi eq, %arg2, %c0_i32 : i32
    %1 = arith.extui %0 : i1 to i32
    %c0_i32_0 = arith.constant 0 : i32
    %2 = arith.cmpi ne, %1, %c0_i32_0 : i32
    scf.if %2 {
      %cst_31 = arith.constant 0.000000e+00 : f32
      %57 = vector.broadcast %cst_31 : f32 to vector<2x128xf32>
      %c0_32 = arith.constant 0 : index
      %c0_33 = arith.constant 0 : index
      %58 = vector.load %arg8[%c0_32, %c0_33] : memref<2x128xf32, #tpu.memory_space<vmem>>, vector<2x128xf32>
      tpu.vector_store %arg8[%c0_32, %c0_33], %57 {strides = array<i32>} : memref<2x128xf32, #tpu.memory_space<vmem>>, vector<2x128xf32>,
      %cst_34 = arith.constant 0.000000e+00 : f32
      %59 = vector.broadcast %cst_34 : f32 to vector<2x128xf32>
      %c0_35 = arith.constant 0 : index
      %c0_36 = arith.constant 0 : index
      %60 = vector.load %arg9[%c0_35, %c0_36] : memref<2x128xf32, #tpu.memory_space<vmem>>, vector<2x128xf32>
      tpu.vector_store %arg9[%c0_35, %c0_36], %59 {strides = array<i32>} : memref<2x128xf32, #tpu.memory_space<vmem>>, vector<2x128xf32>,
    } else {
    }
    %c0 = arith.constant 0 : index
    %c0_1 = arith.constant 0 : index
    %c0_2 = arith.constant 0 : index
    %3 = vector.load %arg5[%c0, %c0_1, %c0_2] : memref<1x2x128xf32, #tpu.memory_space<vmem>>, vector<1x2x128xf32>
    %4 = vector.shape_cast %3 : vector<1x2x128xf32> to vector<2x128xf32>
    %c0_3 = arith.constant 0 : index
    %c0_4 = arith.constant 0 : index
    %c0_5 = arith.constant 0 : index
    %5 = vector.load %arg4[%c0_3, %c0_4, %c0_5] : memref<1x2x128xi32, #tpu.memory_space<vmem>>, vector<1x2x128xi32>
    %6 = vector.shape_cast %5 : vector<1x2x128xi32> to vector<2x128xi32>
    %c0_6 = arith.constant 0 : index
    %c0_7 = arith.constant 0 : index
    %c0_8 = arith.constant 0 : index
    %c0_9 = arith.constant 0 : index
    %7 = vector.load %arg3[%c0_6, %c0_7, %c0_8, %c0_9] : memref<1x4x2x128xf32, #tpu.memory_space<vmem>>, vector<1x1x2x128xf32>
    %8 = vector.shape_cast %7 : vector<1x1x2x128xf32> to vector<2x128xf32>
    %c0_10 = arith.constant 0 : index
    %c1 = arith.constant 1 : index
    %c0_11 = arith.constant 0 : index
    %c0_12 = arith.constant 0 : index
    %9 = vector.load %arg3[%c0_10, %c1, %c0_11, %c0_12] : memref<1x4x2x128xf32, #tpu.memory_space<vmem>>, vector<1x1x2x128xf32>
    %10 = vector.shape_cast %9 : vector<1x1x2x128xf32> to vector<2x128xf32>
    %c0_13 = arith.constant 0 : index
    %c2 = arith.constant 2 : index
    %c0_14 = arith.constant 0 : index
    %c0_15 = arith.constant 0 : index
    %11 = vector.load %arg3[%c0_13, %c2, %c0_14, %c0_15] : memref<1x4x2x128xf32, #tpu.memory_space<vmem>>, vector<1x1x2x128xf32>
    %12 = vector.shape_cast %11 : vector<1x1x2x128xf32> to vector<2x128xf32>
    %c0_16 = arith.constant 0 : index
    %c3 = arith.constant 3 : index
    %c0_17 = arith.constant 0 : index
    %c0_18 = arith.constant 0 : index
    %13 = vector.load %arg3[%c0_16, %c3, %c0_17, %c0_18] : memref<1x4x2x128xf32, #tpu.memory_space<vmem>>, vector<1x1x2x128xf32>
    %14 = vector.shape_cast %13 : vector<1x1x2x128xf32> to vector<2x128xf32>
    %cst = arith.constant 0.000000e+00 : f32
    %15 = vector.broadcast %cst : f32 to vector<2x128xf32>
    %c0_i32_19 = arith.constant 0 : i32
    %16 = vector.broadcast %c0_i32_19 : i32 to vector<2x128xi32>
    %17 = arith.cmpi eq, %6, %16 : vector<2x128xi32>
    %18 = arith.select %17, %8, %15 : vector<2x128xi1>, vector<2x128xf32>
    %c1_i32 = arith.constant 1 : i32
    %19 = vector.broadcast %c1_i32 : i32 to vector<2x128xi32>
    %20 = arith.cmpi eq, %6, %19 : vector<2x128xi32>
    %21 = arith.select %20, %10, %18 : vector<2x128xi1>, vector<2x128xf32>
    %c2_i32 = arith.constant 2 : i32
    %22 = vector.broadcast %c2_i32 : i32 to vector<2x128xi32>
    %23 = arith.cmpi eq, %6, %22 : vector<2x128xi32>
    %24 = arith.select %23, %12, %21 : vector<2x128xi1>, vector<2x128xf32>
    %c3_i32 = arith.constant 3 : i32
    %25 = vector.broadcast %c3_i32 : i32 to vector<2x128xi32>
    %26 = arith.cmpi eq, %6, %25 : vector<2x128xi32>
    %27 = arith.select %26, %14, %24 : vector<2x128xi1>, vector<2x128xf32>
    %28 = arith.maximumf %8, %10 : vector<2x128xf32>
    %29 = arith.maximumf %28, %12 : vector<2x128xf32>
    %30 = arith.maximumf %29, %14 : vector<2x128xf32>
    %cst_20 = arith.constant 0.000000e+00 : f32
    %31 = vector.broadcast %cst_20 : f32 to vector<2x128xf32>
    %32 = arith.subf %8, %30 : vector<2x128xf32>
    %33 = math.exp %32 : vector<2x128xf32>
    %34 = arith.addf %31, %33 : vector<2x128xf32>
    %35 = arith.subf %10, %30 : vector<2x128xf32>
    %36 = math.exp %35 : vector<2x128xf32>
    %37 = arith.addf %34, %36 : vector<2x128xf32>
    %38 = arith.subf %12, %30 : vector<2x128xf32>
    %39 = math.exp %38 : vector<2x128xf32>
    %40 = arith.addf %37, %39 : vector<2x128xf32>
    %41 = arith.subf %14, %30 : vector<2x128xf32>
    %42 = math.exp %41 : vector<2x128xf32>
    %43 = arith.addf %40, %42 : vector<2x128xf32>
    %44 = math.log %43 : vector<2x128xf32>
    %45 = arith.addf %30, %44 : vector<2x128xf32>
    %46 = arith.subf %45, %27 : vector<2x128xf32>
    %47 = arith.mulf %46, %4 : vector<2x128xf32>
    %c0_21 = arith.constant 0 : index
    %c0_22 = arith.constant 0 : index
    %48 = vector.load %arg8[%c0_21, %c0_22] : memref<2x128xf32, #tpu.memory_space<vmem>>, vector<2x128xf32>
    %49 = arith.addf %48, %47 : vector<2x128xf32>
    %c0_23 = arith.constant 0 : index
    %c0_24 = arith.constant 0 : index
    %50 = vector.load %arg8[%c0_23, %c0_24] : memref<2x128xf32, #tpu.memory_space<vmem>>, vector<2x128xf32>
    tpu.vector_store %arg8[%c0_23, %c0_24], %49 {strides = array<i32>} : memref<2x128xf32, #tpu.memory_space<vmem>>, vector<2x128xf32>,
    %c0_25 = arith.constant 0 : index
    %c0_26 = arith.constant 0 : index
    %51 = vector.load %arg9[%c0_25, %c0_26] : memref<2x128xf32, #tpu.memory_space<vmem>>, vector<2x128xf32>
    %52 = arith.addf %51, %4 : vector<2x128xf32>
    %c0_27 = arith.constant 0 : index
    %c0_28 = arith.constant 0 : index
    %53 = vector.load %arg9[%c0_27, %c0_28] : memref<2x128xf32, #tpu.memory_space<vmem>>, vector<2x128xf32>
    tpu.vector_store %arg9[%c0_27, %c0_28], %52 {strides = array<i32>} : memref<2x128xf32, #tpu.memory_space<vmem>>, vector<2x128xf32>,
    %c0_i32_29 = arith.constant 0 : i32
    %54 = arith.cmpi eq, %arg2, %c0_i32_29 : i32
    %55 = arith.extui %54 : i1 to i32
    %c0_i32_30 = arith.constant 0 : i32
    %56 = arith.cmpi ne, %55, %c0_i32_30 : i32
    scf.if %56 {
      %c0_31 = arith.constant 0 : index
      %c0_32 = arith.constant 0 : index
      %57 = vector.load %arg8[%c0_31, %c0_32] : memref<2x128xf32, #tpu.memory_space<vmem>>, vector<2x128xf32>
      %58 = vector.shape_cast %57 : vector<2x128xf32> to vector<1x2x128xf32>
      %cst_33 = arith.constant dense<0.000000e+00> : vector<1xf32>
      %59 = vector.multi_reduction <add>, %58, %cst_33 [1, 2] : vector<1x2x128xf32> to vector<1xf32>
      %60 = vector.shape_cast %59 : vector<1xf32> to vector<1x1x1xf32>
      %61 = vector.extract %60[0, 0, 0] : f32 from vector<1x1x1xf32>
      %62 = vector.broadcast %61 : f32 to vector<1x1xf32>
      %c0_34 = arith.constant 0 : index
      %c0_35 = arith.constant 0 : index
      %c0_36 = arith.constant 0 : index
      %c0_37 = arith.constant 0 : index
      %63 = vector.load %arg6[%c0_34, %c0_35, %c0_36, %c0_37] : memref<1x1x1x1xf32, #tpu.memory_space<vmem>>, vector<1x1x1x1xf32>
      %64 = vector.shape_cast %63 : vector<1x1x1x1xf32> to vector<1x1xf32>
      %65 = vector.shape_cast %62 : vector<1x1xf32> to vector<1x1x1x1xf32>
      tpu.vector_store %arg6[%c0_34, %c0_35, %c0_36, %c0_37], %65 {strides = array<i32>} : memref<1x1x1x1xf32, #tpu.memory_space<vmem>>, vector<1x1x1x1xf32>,
      %c0_38 = arith.constant 0 : index
      %c0_39 = arith.constant 0 : index
      %66 = vector.load %arg9[%c0_38, %c0_39] : memref<2x128xf32, #tpu.memory_space<vmem>>, vector<2x128xf32>
      %67 = vector.shape_cast %66 : vector<2x128xf32> to vector<1x2x128xf32>
      %cst_40 = arith.constant dense<0.000000e+00> : vector<1xf32>
      %68 = vector.multi_reduction <add>, %67, %cst_40 [1, 2] : vector<1x2x128xf32> to vector<1xf32>
      %69 = vector.shape_cast %68 : vector<1xf32> to vector<1x1x1xf32>
      %70 = vector.extract %69[0, 0, 0] : f32 from vector<1x1x1xf32>
      %71 = vector.broadcast %70 : f32 to vector<1x1xf32>
      %c0_41 = arith.constant 0 : index
      %c0_42 = arith.constant 0 : index
      %c0_43 = arith.constant 0 : index
      %c0_44 = arith.constant 0 : index
      %72 = vector.load %arg7[%c0_41, %c0_42, %c0_43, %c0_44] : memref<1x1x1x1xf32, #tpu.memory_space<vmem>>, vector<1x1x1x1xf32>
      %73 = vector.shape_cast %72 : vector<1x1x1x1xf32> to vector<1x1xf32>
      %74 = vector.shape_cast %71 : vector<1x1xf32> to vector<1x1x1x1xf32>
      tpu.vector_store %arg7[%c0_41, %c0_42, %c0_43, %c0_44], %74 {strides = array<i32>} : memref<1x1x1x1xf32, #tpu.memory_space<vmem>>, vector<1x1x1x1xf32>,
    } else {
    }
    return
  }
  func.func @transform_0(%arg0: i32, %arg1: i32, %arg2: i32) -> (i32, i32, i32, i32) {
    %c1_i32 = arith.constant 1 : i32
    %0 = arith.muli %arg1, %c1_i32 : i32
    %1 = arith.addi %0, %arg2 : i32
    %c0_i32 = arith.constant 0 : i32
    %c0_i32_0 = arith.constant 0 : i32
    %c0_i32_1 = arith.constant 0 : i32
    return %arg0, %c0_i32, %1, %c0_i32_0 : i32, i32, i32, i32
  }
  func.func @transform_1(%arg0: i32, %arg1: i32, %arg2: i32) -> (i32, i32, i32) {
    %c1_i32 = arith.constant 1 : i32
    %0 = arith.muli %arg1, %c1_i32 : i32
    %1 = arith.addi %0, %arg2 : i32
    %c0_i32 = arith.constant 0 : i32
    %c0_i32_0 = arith.constant 0 : i32
    return %arg0, %1, %c0_i32 : i32, i32, i32
  }
  func.func @transform_2(%arg0: i32, %arg1: i32, %arg2: i32) -> (i32, i32, i32) {
    %c1_i32 = arith.constant 1 : i32
    %0 = arith.muli %arg1, %c1_i32 : i32
    %1 = arith.addi %0, %arg2 : i32
    %c0_i32 = arith.constant 0 : i32
    %c0_i32_0 = arith.constant 0 : i32
    return %arg0, %1, %c0_i32 : i32, i32, i32
  }
  func.func @transform_3(%arg0: i32, %arg1: i32, %arg2: i32) -> (i32, i32, i32, i32) {
    %c0_i32 = arith.constant 0 : i32
    %c0_i32_0 = arith.constant 0 : i32
    %c0_i32_1 = arith.constant 0 : i32
    return %arg0, %arg1, %c0_i32, %c0_i32_0 : i32, i32, i32, i32
  }
  func.func @transform_4(%arg0: i32, %arg1: i32, %arg2: i32) -> (i32, i32, i32, i32) {
    %c0_i32 = arith.constant 0 : i32
    %c0_i32_0 = arith.constant 0 : i32
    %c0_i32_1 = arith.constant 0 : i32
    return %arg0, %arg1, %c0_i32, %c0_i32_0 : i32, i32, i32, i32
  }
}

</mosaic_0001>

<bundles_post_ra>
// kernel: tpu_custom_call.1
= control target key start
LH: loop header
LB: loop body
LE: loop exit
PB: predicated region body
PF: predicated region fallthrough
CT: control target
= control target key end

     0   :  { %10 = vsyncpa [#allocation5], 0  ;;  %s1006_s0 = inlined_call_operand.hbm [shape: f32[2,4,2,128], index: 0, kind: input, shape index: {}]   ;;  %s1007_s1 = inlined_call_operand.hbm [shape: s32[2,2,128], index: 1, kind: input, shape index: {}]   ;;  %s1008_s2 = inlined_call_operand.vmem [shape: f32[2,2,128], index: 2, kind: input, shape index: {}]   ;;  %s1009_s3 = inlined_call_operand.vmem [shape: f32[2,1,1,1], index: 3, kind: output, shape index: {0}]   ;;  %s1010_s4 = inlined_call_operand.vmem [shape: f32[2,1,1,1], index: 4, kind: output, shape index: {1}]  }
   0x1   :  { %12 = vsyncpa [#allocation5 + $0x1], 0 }
   0x2   :  { %13 = vsyncpa [#allocation7], 0 }
   0x3   :  { %15 = vsyncpa [#allocation7 + $0x1], 0  ;;  %s828_s15 = smov 0   ;;  %s830_s16 = smov 0  }
   0x4   :  { %s832_s17 = smov 0   ;;  %s834_s18 = smov 0  }
   0x5   :  { %s836_s19 = smov 0   ;;  %s838_s20 = smov 0  }
   0x6 LB: > { %s586_s21 = sadd.s32 4294967295, %s796_s20   ;;  %s40_s22 = sadd.s32 1, %s792_s19  ;;  %s796_s20 = sphi %s838_s20, %s21_s20   ;;  %s792_s19 = sphi %s836_s19, %s1022_s19   ;;  %s788_s18 = sphi %s834_s18, %s1021_s18   ;;  %s784_s17 = sphi %s832_s17, %s1020_s17   ;;  %s780_s16 = sphi %s830_s16, %s1019_s16   ;;  %s776_s15 = sphi %s828_s15, %s1018_s15  }
   0x7   : > { %p42_p0 = scmp.ge.s32.totalorder %s40_s22, 2  ;;  %s51_s23 = sadd.s32 1, %s784_s17 }
   0x8   : > { %p58_p1 = scmp.ne.s32.totalorder %s784_s17, %s780_s16  ;;  %p59_p2 = scmp.eq.s32.totalorder %s796_s20, 0 }
   0x9   : > { %s1024_s22 = smov (%p42_p0, %s40_s22), 0  ;;  %p64_p4 = scmp.ne.s32.totalorder %s780_s16, %s776_s15 }
   0xa   : > { %p864_p3 = por %p59_p2, %p58_p1  ;;  %s46_s25 = ssub.s32 %s792_s19, %s1024_s22 }
   0xb   : > { %p65_p5 = scmp.eq.s32.totalorder %s586_s21, 0  ;;  %p49_p6 = scmp.eq.s32.totalorder %s46_s25, 0 }
   0xc   : > { %p620_p8 = scmp.lt.s32.totalorder %s796_s20, 2  ;;  %s880_s28 = sand.u32 1, %s784_s17  }
   0xd   : > { %p871_p7 = por %p65_p5, %p64_p4  ;;  %s604_s29 = sshll.u32 %s792_s19, 7 }
   0xe   : > { %s877_s27 = scalar_select %p49_p6, %s784_s17, %s51_s23  }
   0xf   : > { %s1013_s26 = scalar_select %p871_p7, 1, 0 }
  0x10   : > { %s590_s30 = sshll.u32 %s880_s28, 3  ;;  %s887_s7 = scalar_lea.hbm %s1006_s0, %s604_s29 }
  0x11   : > { %s208_s8 = scalar_lea.vmem [#allocation4], %s590_s30  ;;  %p891_p9 = pnand %p620_p8, %p864_p3 }
  0x12   : > { %s217_s9 = sshll.u32 %s208_s8, 4  ;;  %s205_s11 = scalar_lea.sflag [#allocation5], %s880_s28  ;;  %s895_s9 = int_to_ptr.vmem [resolvable:$true] %s217_s9 }
  0x13   : > { %s682_s12 = scalar_lea.hbm %s887_s7, 128  ;;  %p684_p11 = pneg %p891_p9 }
  0x14   : > { %p683_p10 = scmp.ne.s32.totalorder %s887_s7, %s682_s12  ;;  %s687_s15 = scalar_lea.hbm %s1006_s0, 256 }
  0x15   : > { %p688_p0 = scmp.lt.u32.totalorder %s887_s7, %s1006_s0  ;;  %p689_p1 = scmp.lt.u32.totalorder %s687_s15, %s682_s12 }
  0x16   : > { %p685_p12 = pnand %p684_p11, %p683_p10  ;;  %p691_p3 = scmp.lt.u32.totalorder %s682_s12, %s887_s7 }
  0x17   : > { %p690_p2 = por %p689_p1, %p688_p0 }
  0x18   : > { %p686_p13 = pneg %p685_p12 }
  0x19   : > { %p692_p4 = por %p691_p3, %p690_p2 }
  0x1b   : > { %p693_p5 = pnand %p692_p4, %p686_p13 }
  0x1d   : > { %696 = shalt.err (!%p693_p5)
}
  0x1e   : > { %s697_s24 = scalar_lea.vmem %s895_s9, 128  ;;  %s798_s25 = smov [#allocation4]  }
  0x1f   : > { %p698_p6 = scmp.ne.s32.totalorder %s895_s9, %s697_s24  ;;  %s702_s29 = sshll.u32 %s798_s25, 4  ;;  %s703_s29 = int_to_ptr.vmem [resolvable:$false] %s702_s29 }
  0x20   : > { %s704_s30 = scalar_lea.vmem %s703_s29, 256  ;;  %p705_p12 = scmp.lt.s32.totalorder %s895_s9, %s703_s29 }
  0x21   : > { %p700_p8 = pnand %p698_p6, %p684_p11  ;;  %p706_p0 = scmp.lt.s32.totalorder %s704_s30, %s697_s24 }
  0x23   : > { %p701_p10 = pneg %p700_p8  ;;  %p707_p1 = por %p706_p0, %p705_p12 }
  0x25   : > { %p708_p2 = pnand %p707_p1, %p701_p10 }
  0x27   : > { %711 = shalt.err (!%p708_p2)
}
  0x28   : > { %s799_s5 = smov 32   ;;  %s800_s6 = smov 2  }
  0x29   : > { %616 = dma.hbm_to_vmem [thread:$0]  (!%p891_p9), %s887_s7, 128, %s895_s9, %s205_s11, %s799_s5, %s799_s5, %s800_s6  }
  0x2a   : > { %p595_p13 = scmp.ge.s32.totalorder %s796_s20, 1  ;;  %p257_p3 = scmp.lt.s32.totalorder %s796_s20, 3 }
  0x2b   : > { %s593_s8 = sshll.u32 %s880_s28, 1  ;;  %s594_s13 = sshll.u32 %s792_s19, 5 }
  0x2c   : > { %p928_p4 = pnand %p595_p13, %p257_p3  ;;  %s231_s14 = scalar_lea.vmem [#allocation6], %s593_s8 }
  0x2d   : > { %s240_s15 = sshll.u32 %s231_s14, 4  ;;  %s936_s24 = scalar_lea.hbm %s1007_s1, %s594_s13  ;;  %s241_s15 = int_to_ptr.vmem [resolvable:$true] %s240_s15 }
  0x2e   : > { %s1015_s12 = scalar_select %p928_p4, 1, 0 }
  0x2f   : > { %s228_s7 = scalar_lea.sflag [#allocation7], %s880_s28  ;;  %s712_s9 = scalar_lea.hbm %s936_s24, 32 }
  0x30   : > { %p713_p5 = scmp.ne.s32.totalorder %s936_s24, %s712_s9  ;;  %s717_s29 = scalar_lea.hbm %s1007_s1, 64 }
  0x31   : > { %p718_p10 = scmp.lt.u32.totalorder %s936_s24, %s1007_s1  ;;  %p719_p12 = scmp.lt.u32.totalorder %s717_s29, %s712_s9 }
  0x32   : > { %p715_p6 = pnand %p713_p5, %p684_p11  ;;  %p721_p1 = scmp.lt.u32.totalorder %s712_s9, %s936_s24 }
  0x33   : > { %p720_p0 = por %p719_p12, %p718_p10 }
  0x34   : > { %p716_p8 = pneg %p715_p6 }
  0x35   : > { %p722_p2 = por %p721_p1, %p720_p0 }
  0x37   : > { %p723_p13 = pnand %p722_p2, %p716_p8 }
  0x39   : > { %726 = shalt.err (!%p723_p13)
}
  0x3a   : > { %s727_s28 = scalar_lea.vmem %s241_s15, 32  ;;  %s801_s6 = smov [#allocation6]  }
  0x3b   : > { %p728_p3 = scmp.ne.s32.totalorder %s241_s15, %s727_s28  ;;  %s732_s8 = sshll.u32 %s801_s6, 4  ;;  %s733_s8 = int_to_ptr.vmem [resolvable:$false] %s732_s8 }
  0x3c   : > { %s734_s13 = scalar_lea.vmem %s733_s8, 64  ;;  %p735_p7 = scmp.lt.s32.totalorder %s241_s15, %s733_s8 }
  0x3d   : > { %p730_p5 = pnand %p728_p3, %p684_p11  ;;  %p736_p4 = scmp.lt.s32.totalorder %s734_s13, %s727_s28 }
  0x3f   : > { %p731_p6 = pneg %p730_p5  ;;  %p737_p10 = por %p736_p4, %p735_p7 }
  0x41   : > { %p738_p12 = pnand %p737_p10, %p731_p6 }
  0x43   : > { %741 = shalt.err (!%p738_p12)
}
  0x44   : > { %619 = dma.hbm_to_vmem [thread:$0]  (!%p891_p9), %s936_s24, 32, %s241_s15, %s228_s7  }
  0x45   : > { %p1016_p8 = scmp.ne.s32.totalorder %s1015_s12, 0 }
  0x46   : > { %s263_s14 = sand.u32 (!%p1016_p8), 1, %s780_s16   ;;  %p1017_p11 = scmp.ne.s32.totalorder (!%p1016_p8), %s1013_s26, 0 }
  0x47   : > { %261 = sbr.rel (%p1016_p8) target bundleno = 352 (0x160), region = 32  ;;  %s596_s21 = sshll.u32 (!%p1016_p8), %s263_s14, 3 }
  0x48   : > { %s264_s23 = scalar_lea.sflag (!%p1016_p8), [#allocation5], %s263_s14  ;;  %s267_s9 = scalar_lea.vmem (!%p1016_p8), [#allocation4], %s596_s21 }
  0x4e   : > { %767 = dma.done.wait (%p1017_p11), %s264_s23, 128  }
  0x4f   : > { %769 = vsyncadd (%p1017_p11), %s264_s23, 4294967168  ;;  %s597_s11 = sshll.u32 %s263_s14, 1  ;;  %s273_s25 = scalar_lea.sflag [#allocation7], %s263_s14 }
  0x50   : > { %s965_s10 = scalar_lea.vmem [#allocation6], %s597_s11 }
  0x51   : > { %771 = dma.done.wait (%p1017_p11), %s273_s25, 32  }
  0x52   : > { %773 = vsyncadd (%p1017_p11), %s273_s25, 4294967264  ;;  %p324_p7 = scmp.lt.s32.totalorder %s788_s18, 1  ;;  %v802_v0 = vmov 0.0   ;;  %v352_v1 = vld [vmem:[%s267_s9] sm:$0x3]  ;;  %vm401_vm4 = vcmask 1041408  }
  0x53   : > { %348 = vst [vmem:[#allocation2] sm:$0x3] %v802_v0  ;;  %349 = vst [vmem:[#allocation3] sm:$0x3] %v802_v0  ;;  %v599_v2 = vld [vmem:[%s267_s9 + $0x2] sm:$0x3] }
  0x54   : > { %s1026_s18 = smov (!%p324_p7, %s788_s18), 1  ;;  %v600_v3 = vld [vmem:[%s267_s9 + $0x4] sm:$0x3]  ;;  %v367_v5 = vmax.f32 %v352_v1, %v599_v2  ;;  %v601_v7 = vld [vmem:[%s267_s9 + $0x6] sm:$0x3]  ;;  %vm413_vm5 = vcmask 0  }
  0x55   : > { %s598_s12 = sshll.u32 %s1026_s18, 1  ;;  %v351_v25 = vld [vmem:[%s965_s10] sm:$0x3]  ;;  %s337_s30 = scalar_lea.vmem %s1009_s3, %s1026_s18 }
  0x56   : > { %s330_s7 = scalar_lea.vmem %s1008_s2, %s598_s12  ;;  %v368_v9 = vmax.f32 %v367_v5, %v600_v3  ;;  %vm359_vm0 = vcmp.eq.s32.totalorder %v351_v25, 0  ;;  %vm361_vm1 = vcmp.eq.s32.totalorder %v351_v25, 1  ;;  %vm363_vm2 = vcmp.eq.s32.totalorder %v351_v25, 2  ;;  %s343_s8 = scalar_lea.vmem %s1010_s4, %s1026_s18 }
  0x57   : > { %v350_v4 = vld [vmem:[%s330_s7] sm:$0x3]  ;;  %v360_v27 = vsel %vm359_vm0, %v352_v1, 0.0  ;;  %vm365_vm3 = vcmp.eq.s32.totalorder %v351_v25, 3 }
  0x58   : > { %v369_v10 = vmax.f32 %v368_v9, %v601_v7  ;;  %v362_v28 = vsel %vm361_vm1, %v599_v2, %v360_v27 }
  0x59   : > { %v364_v29 = vsel %vm363_vm2, %v600_v3, %v362_v28 }
  0x5a   : > { %v394_v6 = vld [vmem:[#allocation3] sm:$0x3]  ;;  %v370_v11 = vsub.f32 %v352_v1, %v369_v10  ;;  %v374_v12 = vsub.f32 %v599_v2, %v369_v10  ;;  %v378_v13 = vsub.f32 %v600_v3, %v369_v10  ;;  %v382_v14 = vsub.f32 %v601_v7, %v369_v10  ;;  %v391_v35 = vld [vmem:[#allocation2] sm:$0x3] }
  0x5b   : > { %v395_v8 = vadd.f32 %v394_v6, %v350_v4  ;;  %v366_v32 = vsel %vm365_vm3, %v601_v7, %v364_v29 }
  0x5c   : > { %v371_v15 = vmul.f32 1.442695, %v370_v11  ;;  %v375_v16 = vmul.f32 1.442695, %v374_v12  ;;  %v379_v17 = vmul.f32 1.442695, %v378_v13 }
  0x5d   : > { %396 = vst [vmem:[#allocation3] sm:$0x3] %v395_v8  ;;  %v383_v18 = vmul.f32 1.442695, %v382_v14 }
  0x5e   : > { %672 = vpow2.f32 %v371_v15 }
  0x5f   : > { %674 = vpow2.f32 %v375_v16 }
  0x60   : > { %676 = vpow2.f32 %v379_v17 }
  0x61   : > { %678 = vpow2.f32 %v383_v18 }
  0x64   : > { %v415_v39 = vld [vmem:[#allocation3] sm:$0x3] }
  0x65   : > { %v416_v41 = vsel %vm401_vm4, %v415_v39, 0.0 }
  0x68   : > { %v673_v19 = vpop.eup %672 }
  0x69   : > { %v675_v20 = vpop.eup %674 }
  0x6a   : > { %v677_v21 = vpop.eup %676  ;;  %v377_v22 = vadd.f32 %v675_v20, %v673_v19 }
  0x6b   : > { %v679_v23 = vpop.eup %678 }
  0x6c   : > { %v381_v24 = vadd.f32 %v677_v21, %v377_v22 }
  0x6e   : > { %v385_v26 = vadd.f32 %v679_v23, %v381_v24 }
  0x70   : > { %680 = vlog2.f32 %v385_v26 }
  0x7a   : > { %v681_v30 = vpop.eup %680 }
  0x7b   : > { %v387_v31 = vmul.f32 0.6931472, %v681_v30 }
  0x7d   : > { %v388_v33 = vadd.f32 %v387_v31, %v369_v10 }
  0x7f   : > { %v389_v34 = vsub.f32 %v388_v33, %v366_v32 }
  0x81   : > { %v390_v36 = vmul.f32 %v389_v34, %v350_v4 }
  0x83   : > { %v392_v37 = vadd.f32 %v391_v35, %v390_v36 }
  0x85   : > { %393 = vst [vmem:[#allocation2] sm:$0x3] %v392_v37 }
  0x8c   : > { %v400_v38 = vld [vmem:[#allocation2] sm:$0x3] }
  0x8d   : > { %v402_v40 = vsel %vm401_vm4, %v400_v38, 0.0 }
  0x8e   : > { %403 = vadd.xlane.f32.xlu0 %v402_v40 }
  0x92   : > { %417 = vadd.xlane.f32.xlu0 %v416_v41 }
 0x11b   : > { %v404_v42 = vpop.xlane.xlu0 %403 }
 0x11c   : > { %v405_v43 = vrot.slane %v404_v42, 4 }
 0x11e   : > { %v406_v44 = vadd.f32 %v405_v43, %v404_v42 }
 0x11f   : > { %v418_v45 = vpop.xlane.xlu0 %417 }
 0x120   : > { %v407_v46 = vrot.slane %v406_v44, 2  ;;  %v419_v47 = vrot.slane %v418_v45, 4 }
 0x122   : > { %v420_v48 = vadd.f32 %v419_v47, %v418_v45  ;;  %v408_v49 = vadd.f32 %v407_v46, %v406_v44 }
 0x124   : > { %v421_v50 = vrot.slane %v420_v48, 2  ;;  %v409_v51 = vrot.slane %v408_v49, 1 }
 0x126   : > { %v422_v52 = vadd.f32 %v421_v50, %v420_v48  ;;  %v410_v53 = vadd.f32 %v409_v51, %v408_v49 }
 0x128   : > { %605 = vpush %v410_v53  ;;  %v423_v54 = vrot.slane %v422_v52, 1 }
 0x12a   : > { %v424_v55 = vadd.f32 %v423_v54, %v422_v52 }
 0x12c   : > { %607 = vpush %v424_v55 }
 0x159   : > { %s606_s5 = spop %605 }
 0x15a   : > { %v412_v56 = vstv %s606_s5 }
 0x15b   : > { %414 = vst.msk [vmem:[%s337_s30] sm:$0x1] %vm413_vm5, %v412_v56 }
 0x15d   : > { %s608_s13 = spop %607 }
 0x15e   : > { %v426_v57 = vstv %s608_s13 }
 0x15f   : > { %427 = vst.msk [vmem:[%s343_s8] sm:$0x1] %vm413_vm5, %v426_v57 }
 0x160 PF: > { %s21_s20 = sadd.s32 1, %s796_s20   ;;  %s1018_s15 = smov %s780_s16 }
 0x161   : > { %p18_p9 = scmp.ge.s32.totalorder %s21_s20, 4   ;;  %s1019_s16 = smov %s784_s17 }
 0x162   : > { %s1020_s17 = smov %s877_s27  ;;  %s1021_s18 = smov %s792_s19 }
 0x163   : > { %s1022_s19 = smov %s1024_s22  ;;  %20 = sbr.rel (!%p18_p9) target bundleno = 6 (0x6), region = 111 }
 0x16a   :  { %469 = vsyncpa [#allocation5], 1 }
 0x16b   :  { %471 = vsyncpa [#allocation5 + $0x1], 1 }
 0x16c   :  { %472 = vsyncpa [#allocation7], 1 }
 0x16d   :  { %474 = vsyncpa [#allocation7 + $0x1], 1 }

</bundles_post_ra>
